<compile_context>
chip_gen: v7x
topology: tpu7x:2x2x1
jax: 0.10.0
libtpu: 0.0.40
codegen_flags: <defaults>
</compile_context>

<pallas_src>
import jax
import jax.numpy as jnp
from jax.experimental import pallas as pl
from jax.experimental.pallas import tpu as pltpu


def _round_up(n, m):
    return ((n + m - 1) // m) * m


def conet_kernel(x_ref, w_ref, b_ref, o_ref):
    # x_ref: (TB, 128) bf16   = [target_x | auxiliary_x]
    # w_ref: (L+1, 128, 128) bf16 block weights (VMEM-resident across the grid)
    # b_ref: (L+1, 1, 128) f32 block biases
    # o_ref: (TB, 128) f32    lane 0 = target score, lane 1 = auxiliary score
    num_layers = w_ref.shape[0]              # static
    s = x_ref[...]                           # bf16
    for l in range(num_layers - 1):          # cross hidden layers, static unroll
        h = jnp.dot(s, w_ref[l], preferred_element_type=jnp.float32)
        h = h + b_ref[l]                     # (1,128) f32 broadcast
        h = jnp.maximum(h, 0.0)              # ReLU in f32 (VPU-safe on v5e)
        s = h.astype(jnp.bfloat16)           # back to bf16 for the next MXU op
    out = jnp.dot(s, w_ref[num_layers - 1], preferred_element_type=jnp.float32)
    out = out + b_ref[num_layers - 1]
    o_ref[...] = out.astype(o_ref.dtype)


def conet_forward(user_emb, target_emb, aux_emb, w_stack, b_stack):
    """Returns (target_scores, auxiliary_scores), each (B,), f32."""
    B = user_emb.shape[0]
    # Combined two-stream input: [user | target_item | user | aux_item] -> (B, 128).
    x = jnp.concatenate([user_emb, target_emb, user_emb, aux_emb], axis=-1)
    x = x.astype(jnp.bfloat16)
    feat = x.shape[1]
    n_layers = w_stack.shape[0]

    # Batch tile: large enough to pipeline the HBM<->VMEM traffic at real batch sizes,
    # tiny (no waste) at toy B.  VMEM live set at TB=1024:
    #   2 x (TB*128*2B x) + 2 x (TB*128*4B out) + a few f32 (TB,128) temps + <100 KiB weights
    #   ~= 3 MiB  << 32 MiB scoped budget (v7x-safe).
    TB = min(1024, _round_up(B, 8))
    Bp = _round_up(B, TB)
    if Bp != B:
        x = jnp.pad(x, ((0, Bp - B), (0, 0)))
    grid = (pl.cdiv(Bp, TB),)

    cost = pl.CostEstimate(
        flops=2 * Bp * feat * feat * n_layers,
        transcendentals=0,
        bytes_accessed=(Bp * feat * 2                 # x, bf16
                        + Bp * feat * 4               # out, f32
                        + n_layers * feat * feat * 2  # weights, bf16
                        + n_layers * feat * 4),       # biases, f32
    )

    out = pl.pallas_call(
        conet_kernel,
        out_shape=jax.ShapeDtypeStruct((Bp, feat), jnp.float32),
        grid_spec=pltpu.PrefetchScalarGridSpec(
            num_scalar_prefetch=0,
            grid=grid,
            in_specs=[
                pl.BlockSpec((TB, feat), lambda i: (i, 0)),
                # Constant index maps -> params stay resident in VMEM across all batch tiles.
                pl.BlockSpec((n_layers, feat, feat), lambda i: (0, 0, 0)),
                pl.BlockSpec((n_layers, 1, feat), lambda i: (0, 0, 0)),
            ],
            out_specs=pl.BlockSpec((TB, feat), lambda i: (i, 0)),
        ),
        compiler_params=pltpu.CompilerParams(
            dimension_semantics=("parallel",),       # megacore: shard batch over v7x's 2 TCs
            vmem_limit_bytes=32 * 1024 * 1024,       # v7x-safe scoped VMEM budget
        ),
        cost_estimate=cost,
    )(x, w_stack, b_stack)

    return out[:B, 0], out[:B, 1]


def init_conet_params(key, input_size=32, hidden_layers=(64, 64)):
    """PyTorch nn.Linear default init (U(-1/sqrt(fan_in), 1/sqrt(fan_in)) for W and b).
    Weights are stored pre-transposed as [in_features, out_features]."""
    ks = jax.random.split(key, len(hidden_layers) * 6 + 4)

    def lin(kw, kb, fan_in, fan_out):
        bound = fan_in ** -0.5
        W = jax.random.uniform(ks[kw], (fan_in, fan_out), jnp.float32, -bound, bound)
        b = jax.random.uniform(ks[kb], (fan_out,), jnp.float32, -bound, bound)
        return W, b

    last = 2 * input_size
    layers = []
    idx = 0
    for h in hidden_layers:
        # Realized config keeps a uniform 128-wide combined [target|aux] state.
        assert h == 2 * input_size, "this kernel realizes hidden_size == 2*input_size"
        Wt, bt = lin(idx + 0, idx + 1, last, h)   # target_layer
        Wa, ba = lin(idx + 2, idx + 3, last, h)   # auxiliary_layer
        Ws, bs = lin(idx + 4, idx + 5, last, h)   # transfer_layer
        idx += 6
        layers.append((Wt, bt, Wa, ba, Ws, bs))
        last = h
    Wto, bto = lin(idx + 0, idx + 1, last, 1)     # target_output
    Wao, bao = lin(idx + 2, idx + 3, last, 1)     # auxiliary_output
    out_params = (Wto[:, 0], bto[0], Wao[:, 0], bao[0])
    return layers, out_params


def pack_conet_params(layers, out_params):
    """Pack per-layer target/aux/transfer linears into stacked block weights/biases."""
    w_blocks, b_blocks = [], []
    for (Wt, bt, Wa, ba, Ws, bs) in layers:
        w_blocks.append(jnp.block([[Wt, Ws], [Ws, Wa]]))            # (128, 128)
        b_blocks.append(jnp.concatenate([bt + bs, ba + bs]))        # (128,)
    wto, bto, wao, bao = out_params
    d = wto.shape[0]
    W_out = jnp.zeros((2 * d, 2 * d), jnp.float32)
    W_out = W_out.at[:d, 0].set(wto).at[d:, 1].set(wao)             # lane-dense padded heads
    b_out = jnp.zeros((2 * d,), jnp.float32).at[0].set(bto).at[1].set(bao)
    w_blocks.append(W_out)
    b_blocks.append(b_out)
    w_stack = jnp.stack(w_blocks).astype(jnp.bfloat16)              # (L+1, 128, 128)
    b_stack = jnp.stack(b_blocks)[:, None, :].astype(jnp.float32)   # (L+1, 1, 128)
    return w_stack, b_stack


def conet_reference(user_emb, tgt_emb, aux_emb, layers, out_params):
    """Pure-JAX f32 reference faithful to the PyTorch module's forward."""
    t = jnp.concatenate([user_emb, tgt_emb], axis=-1)
    a = jnp.concatenate([user_emb, aux_emb], axis=-1)
    for (Wt, bt, Wa, ba, Ws, bs) in layers:
        new_t = t @ Wt + bt + a @ Ws + bs
        new_a = a @ Wa + ba + t @ Ws + bs
        t, a = jnp.maximum(new_t, 0.0), jnp.maximum(new_a, 0.0)
    wto, bto, wao, bao = out_params
    return t @ wto + bto, a @ wao + bao


if __name__ == "__main__":
    key = jax.random.PRNGKey(0)
    k_tab_u, k_tab_i, k_ids, k_params = jax.random.split(key, 4)

    B = 8
    EMB = 32
    NUM_USERS, NUM_ITEMS = 16, 32
    HIDDEN = (64, 64)

    # Synthetic useritem_embeds tables; lookup + expand handled in the wrapper.
    user_table = jax.random.normal(k_tab_u, (NUM_USERS, EMB), jnp.float32)
    item_table = jax.random.normal(k_tab_i, (NUM_ITEMS, EMB), jnp.float32)

    k_u, k_ti, k_ai = jax.random.split(k_ids, 3)
    user_ids = jax.random.randint(k_u, (B,), 0, NUM_USERS)
    target_item_ids = jax.random.randint(k_ti, (B,), 0, NUM_ITEMS)
    aux_item_ids = jax.random.randint(k_ai, (B,), 0, NUM_ITEMS)

    user_emb = jnp.take(user_table, user_ids, axis=0)
    target_emb = jnp.take(item_table, target_item_ids, axis=0)
    aux_emb = jnp.take(item_table, aux_item_ids, axis=0)

    layers, out_params = init_conet_params(k_params, input_size=EMB, hidden_layers=HIDDEN)
    w_stack, b_stack = pack_conet_params(layers, out_params)

    tgt_score, aux_score = conet_forward(user_emb, target_emb, aux_emb, w_stack, b_stack)
    tgt_score, aux_score = jax.block_until_ready((tgt_score, aux_score))

    ref_t, ref_a = conet_reference(user_emb, target_emb, aux_emb, layers, out_params)
    assert tgt_score.shape == (B,), tgt_score.shape
    assert aux_score.shape == (B,), aux_score.shape
    # bf16 weight/activation storage -> tolerance loosened vs the f32 reference.
    assert jnp.allclose(tgt_score, ref_t, atol=3e-2, rtol=3e-2), "target score mismatch"
    assert jnp.allclose(aux_score, ref_a, atol=3e-2, rtol=3e-2), "auxiliary score mismatch"

    print("KERNEL_OK")
</pallas_src>

<mosaic_0001>
module attributes {stable_mosaic.version = 11 : i64} {
  func.func @conet_kernel(%arg0: i32, %arg1: memref<8x128xbf16, #tpu.memory_space<vmem>>, %arg2: memref<3x128x128xbf16, #tpu.memory_space<vmem>>, %arg3: memref<3x1x128xf32, #tpu.memory_space<vmem>>, %arg4: memref<8x128xf32, #tpu.memory_space<vmem>>) attributes {dimension_semantics = [#tpu.dimension_semantics<parallel>], iteration_bounds = array<i64: 1>, scalar_prefetch = 0 : i64, scratch_operands = 0 : i64, tpu.core_type = #tpu.core_type<tc>, window_params = [{transform_indices = @transform_0, window_bounds = array<i64: 8, 128>}, {pipeline_mode = #tpu.pipeline_mode<synchronous>, transform_indices = @transform_1, window_bounds = array<i64: 3, 128, 128>}, {pipeline_mode = #tpu.pipeline_mode<synchronous>, transform_indices = @transform_2, window_bounds = array<i64: 3, 1, 128>}, {transform_indices = @transform_3, window_bounds = array<i64: 8, 128>}]} {
    %c0 = arith.constant 0 : index
    %c0_0 = arith.constant 0 : index
    %0 = vector.load %arg1[%c0, %c0_0] : memref<8x128xbf16, #tpu.memory_space<vmem>>, vector<8x128xbf16>
    %c0_1 = arith.constant 0 : index
    %c0_2 = arith.constant 0 : index
    %c0_3 = arith.constant 0 : index
    %1 = vector.load %arg2[%c0_1, %c0_2, %c0_3] : memref<3x128x128xbf16, #tpu.memory_space<vmem>>, vector<1x128x128xbf16>
    %2 = vector.shape_cast %1 : vector<1x128x128xbf16> to vector<128x128xbf16>
    %cst = arith.constant dense<0.000000e+00> : vector<8x128xf32>
    %3 = tpu.matmul %0, %2, %cst {dimension_numbers = #tpu.dot_dimension_numbers<[1], [0], [0], [1], [0, 0, 1, 1], [], []>} : vector<8x128xbf16>, vector<128x128xbf16>, vector<8x128xf32> -> vector<8x128xf32>
    %c0_4 = arith.constant 0 : index
    %c0_5 = arith.constant 0 : index
    %c0_6 = arith.constant 0 : index
    %4 = vector.load %arg3[%c0_4, %c0_5, %c0_6] : memref<3x1x128xf32, #tpu.memory_space<vmem>>, vector<1x1x128xf32>
    %5 = vector.shape_cast %4 : vector<1x1x128xf32> to vector<1x128xf32>
    %6 = vector.broadcast %5 : vector<1x128xf32> to vector<8x128xf32>
    %7 = arith.addf %3, %6 : vector<8x128xf32>
    %cst_7 = arith.constant 0.000000e+00 : f32
    %8 = vector.broadcast %cst_7 : f32 to vector<8x128xf32>
    %9 = arith.maximumf %7, %8 : vector<8x128xf32>
    %10 = arith.truncf %9 : vector<8x128xf32> to vector<8x128xbf16>
    %c1 = arith.constant 1 : index
    %c0_8 = arith.constant 0 : index
    %c0_9 = arith.constant 0 : index
    %11 = vector.load %arg2[%c1, %c0_8, %c0_9] : memref<3x128x128xbf16, #tpu.memory_space<vmem>>, vector<1x128x128xbf16>
    %12 = vector.shape_cast %11 : vector<1x128x128xbf16> to vector<128x128xbf16>
    %cst_10 = arith.constant dense<0.000000e+00> : vector<8x128xf32>
    %13 = tpu.matmul %10, %12, %cst_10 {dimension_numbers = #tpu.dot_dimension_numbers<[1], [0], [0], [1], [0, 0, 1, 1], [], []>} : vector<8x128xbf16>, vector<128x128xbf16>, vector<8x128xf32> -> vector<8x128xf32>
    %c1_11 = arith.constant 1 : index
    %c0_12 = arith.constant 0 : index
    %c0_13 = arith.constant 0 : index
    %14 = vector.load %arg3[%c1_11, %c0_12, %c0_13] : memref<3x1x128xf32, #tpu.memory_space<vmem>>, vector<1x1x128xf32>
    %15 = vector.shape_cast %14 : vector<1x1x128xf32> to vector<1x128xf32>
    %16 = vector.broadcast %15 : vector<1x128xf32> to vector<8x128xf32>
    %17 = arith.addf %13, %16 : vector<8x128xf32>
    %cst_14 = arith.constant 0.000000e+00 : f32
    %18 = vector.broadcast %cst_14 : f32 to vector<8x128xf32>
    %19 = arith.maximumf %17, %18 : vector<8x128xf32>
    %20 = arith.truncf %19 : vector<8x128xf32> to vector<8x128xbf16>
    %c2 = arith.constant 2 : index
    %c0_15 = arith.constant 0 : index
    %c0_16 = arith.constant 0 : index
    %21 = vector.load %arg2[%c2, %c0_15, %c0_16] : memref<3x128x128xbf16, #tpu.memory_space<vmem>>, vector<1x128x128xbf16>
    %22 = vector.shape_cast %21 : vector<1x128x128xbf16> to vector<128x128xbf16>
    %cst_17 = arith.constant dense<0.000000e+00> : vector<8x128xf32>
    %23 = tpu.matmul %20, %22, %cst_17 {dimension_numbers = #tpu.dot_dimension_numbers<[1], [0], [0], [1], [0, 0, 1, 1], [], []>} : vector<8x128xbf16>, vector<128x128xbf16>, vector<8x128xf32> -> vector<8x128xf32>
    %c2_18 = arith.constant 2 : index
    %c0_19 = arith.constant 0 : index
    %c0_20 = arith.constant 0 : index
    %24 = vector.load %arg3[%c2_18, %c0_19, %c0_20] : memref<3x1x128xf32, #tpu.memory_space<vmem>>, vector<1x1x128xf32>
    %25 = vector.shape_cast %24 : vector<1x1x128xf32> to vector<1x128xf32>
    %26 = vector.broadcast %25 : vector<1x128xf32> to vector<8x128xf32>
    %27 = arith.addf %23, %26 : vector<8x128xf32>
    %c0_21 = arith.constant 0 : index
    %c0_22 = arith.constant 0 : index
    %28 = vector.load %arg4[%c0_21, %c0_22] : memref<8x128xf32, #tpu.memory_space<vmem>>, vector<8x128xf32>
    tpu.vector_store %arg4[%c0_21, %c0_22], %27 {strides = array<i32>} : memref<8x128xf32, #tpu.memory_space<vmem>>, vector<8x128xf32>,
    return
  }
  func.func @transform_0(%arg0: i32) -> (i32, i32) {
    %c0_i32 = arith.constant 0 : i32
    %c0_i32_0 = arith.constant 0 : i32
    return %arg0, %c0_i32 : i32, i32
  }
  func.func @transform_1(%arg0: i32) -> (i32, i32, i32) {
    %c0_i32 = arith.constant 0 : i32
    %c0_i32_0 = arith.constant 0 : i32
    %c0_i32_1 = arith.constant 0 : i32
    %c0_i32_2 = arith.constant 0 : i32
    return %c0_i32, %c0_i32_0, %c0_i32_1 : i32, i32, i32
  }
  func.func @transform_2(%arg0: i32) -> (i32, i32, i32) {
    %c0_i32 = arith.constant 0 : i32
    %c0_i32_0 = arith.constant 0 : i32
    %c0_i32_1 = arith.constant 0 : i32
    %c0_i32_2 = arith.constant 0 : i32
    return %c0_i32, %c0_i32_0, %c0_i32_1 : i32, i32, i32
  }
  func.func @transform_3(%arg0: i32) -> (i32, i32) {
    %c0_i32 = arith.constant 0 : i32
    %c0_i32_0 = arith.constant 0 : i32
    return %arg0, %c0_i32 : i32, i32
  }
}

</mosaic_0001>

<bundles_post_ra>
// kernel: tpu_custom_call.1
= control target key start
LH: loop header
LB: loop body
LE: loop exit
PB: predicated region body
PF: predicated region fallthrough
CT: control target
= control target key end

     0   :  { %8 = vsyncpa [#allocation3], 0  ;;  %s729_s0 = inlined_call_operand.hbm [shape: bf16[8,128], index: 0, kind: input, shape index: {}]   ;;  %s730_s1 = inlined_call_operand.hbm [shape: bf16[3,128,128], index: 1, kind: input, shape index: {}]   ;;  %s731_s2 = inlined_call_operand.vmem [shape: f32[3,1,128], index: 2, kind: input, shape index: {}]   ;;  %s732_s3 = inlined_call_operand.hbm [shape: f32[8,128], index: 3, kind: output, shape index: {}]  }
   0x1   :  { %9 = vsyncpa [#allocation6], 0 }
   0x2   :  { %10 = vsyncpa [#allocation4], 0  ;;  %s620_s12 = smov [#allocation2]   ;;  %s621_s14 = smov [#allocation5]  }
   0x3   :  { %s17_s13 = sshll.u32 %s620_s12, 4  ;;  %s26_s15 = sshll.u32 %s621_s14, 4  ;;  %s18_s13 = int_to_ptr.vmem [resolvable:$true] %s17_s13  ;;  %s647_s15 = int_to_ptr.vmem [resolvable:$true] %s26_s15 }
   0x4   :  { %s548_s18 = scalar_lea.hbm %s729_s0, 64 }
   0x5   :  { %p549_p0 = scmp.ne.s32.totalorder %s729_s0, %s548_s18  ;;  %p552_p1 = scmp.lt.u32.totalorder %s548_s18, %s729_s0 }
   0x7   :  { %p554_p2 = pnand %p552_p1, %p549_p0 }
   0x9   :  { %557 = shalt.err (!%p554_p2)
}
   0xa   :  { %s558_s23 = scalar_lea.vmem %s18_s13, 64  ;;  %p563_p4 = scmp.lt.s32.totalorder %s18_s13, %s18_s13 }
   0xb   :  { %p559_p3 = scmp.ne.s32.totalorder %s18_s13, %s558_s23  ;;  %p564_p5 = scmp.lt.s32.totalorder %s558_s23, %s558_s23 }
   0xd   :  { %p565_p6 = por %p564_p5, %p563_p4 }
   0xf   :  { %p566_p7 = pnand %p565_p6, %p559_p3 }
  0x11   :  { %569 = shalt.err (!%p566_p7)
}
  0x12   :  { %20 = dma.hbm_to_vmem [thread:$0]  %s729_s0, 64, %s18_s13, [#allocation3]  }
  0x13   :  { %s570_s28 = scalar_lea.hbm %s730_s1, 3072 }
  0x14   :  { %p571_p8 = scmp.ne.s32.totalorder %s730_s1, %s570_s28  ;;  %p574_p9 = scmp.lt.u32.totalorder %s570_s28, %s730_s1 }
  0x16   :  { %p576_p10 = pnand %p574_p9, %p571_p8 }
  0x18   :  { %579 = shalt.err (!%p576_p10)
}
  0x19   :  { %s580_s6 = scalar_lea.vmem %s647_s15, 3072  ;;  %p585_p12 = scmp.lt.s32.totalorder %s647_s15, %s647_s15 }
  0x1a   :  { %p581_p11 = scmp.ne.s32.totalorder %s647_s15, %s580_s6  ;;  %p586_p13 = scmp.lt.s32.totalorder %s580_s6, %s580_s6 }
  0x1c   :  { %p587_p0 = por %p586_p13, %p585_p12 }
  0x1e   :  { %p588_p1 = pnand %p587_p0, %p581_p11 }
  0x20   :  { %591 = shalt.err (!%p588_p1)
}
  0x21   :  { %s622_s0 = smov 64   ;;  %s623_s7 = smov 4  }
  0x22   :  { %32 = dma.hbm_to_vmem [thread:$0]  %s730_s1, 3072, %s647_s15, [#allocation6], %s622_s0, %s622_s0, %s623_s7  }
  0x23   :  { %614 = dma.done.wait [#allocation3], 64  }
  0x24   :  { %615 = vsyncadd [#allocation3], 4294967232 }
  0x25   :  { %616 = dma.done.wait [#allocation6], 3072  }
  0x26   :  { %617 = vsyncadd [#allocation6], 4294964224  ;;  %v624_v0 = vmov 0.0   ;;  %vm625_vm0 = vmmov 0   ;;  %v524_v1 = vld [vmem:[#allocation5] sm:$0xff]   ;;  %v525_v2 = vld [vmem:[#allocation5 + $0x8] sm:$0xff]  }
  0x27   :  { %457 = vmatprep.subr.bf16.mxu0 %v624_v0  ;;  %473 = vmatprep.mubr.msk.bf16.mxu0 %vm625_vm0, %v624_v0  ;;  %v526_v3 = vld [vmem:[#allocation5 + $0x10] sm:$0xff]   ;;  %v532_v4 = vld [vmem:[#allocation5 + $0x40] sm:$0xff]   ;;  %v527_v5 = vld [vmem:[#allocation5 + $0x18] sm:$0xff]   ;;  %s626_s15 = smov [#allocation7]  }
  0x28   :  { %477 = vmatprep.subr.bf16.mxu1 %v624_v0  ;;  %493 = vmatprep.mubr.msk.bf16.mxu1 %vm625_vm0, %v624_v0  ;;  %v533_v6 = vld [vmem:[#allocation5 + $0x48] sm:$0xff]   ;;  %v528_v7 = vld [vmem:[#allocation5 + $0x20] sm:$0xff]   ;;  %v534_v8 = vld [vmem:[#allocation5 + $0x50] sm:$0xff]   ;;  %s391_s16 = sshll.u32 %s626_s15, 4  ;;  %s392_s16 = int_to_ptr.vmem [resolvable:$true] %s391_s16 }
  0x29   :  { %458 = vmatpush3.bf16.msra.mxu0 %v524_v1  ;;  %478 = vmatpush3.bf16.msra.mxu1 %v532_v4  ;;  %v529_v9 = vld [vmem:[#allocation5 + $0x28] sm:$0xff]   ;;  %v535_v10 = vld [vmem:[#allocation5 + $0x58] sm:$0xff]   ;;  %v530_v11 = vld [vmem:[#allocation5 + $0x30] sm:$0xff]   ;;  %s592_s17 = scalar_lea.vmem %s392_s16, 128  ;;  %p597_p3 = scmp.lt.s32.totalorder %s392_s16, %s392_s16 }
  0x2a   :  { %459 = vmatprep.subr.bf16.mxu0 %v624_v0  ;;  %479 = vmatprep.subr.bf16.mxu1 %v624_v0  ;;  %v536_v12 = vld [vmem:[#allocation5 + $0x60] sm:$0xff]   ;;  %v531_v13 = vld [vmem:[#allocation5 + $0x38] sm:$0xff]   ;;  %v537_v14 = vld [vmem:[#allocation5 + $0x68] sm:$0xff]   ;;  %p593_p2 = scmp.ne.s32.totalorder %s392_s16, %s592_s17  ;;  %p598_p4 = scmp.lt.s32.totalorder %s592_s17, %s592_s17 }
  0x2b   :  { %v42_v15 = vld [vmem:[#allocation2] sm:$0xf]  ;;  %v538_v16 = vld [vmem:[#allocation5 + $0x70] sm:$0xff]   ;;  %v540_v18 = vld [vmem:[#allocation5 + $0x80] sm:$0xff]  }
  0x2c   :  { %v539_v17 = vld [vmem:[#allocation5 + $0x78] sm:$0xff]   ;;  %v541_v19 = vld [vmem:[#allocation5 + $0x88] sm:$0xff]   ;;  %v542_v20 = vld [vmem:[#allocation5 + $0x90] sm:$0xff]   ;;  %p599_p5 = por %p598_p4, %p597_p3 }
  0x2d   :  { %460 = vmatpush3.bf16.msra.mxu0 %v525_v2  ;;  %480 = vmatpush3.bf16.msra.mxu1 %v533_v6  ;;  %v543_v21 = vld [vmem:[#allocation5 + $0x98] sm:$0xff]   ;;  %v544_v22 = vld [vmem:[#allocation5 + $0xa0] sm:$0xff]   ;;  %v545_v23 = vld [vmem:[#allocation5 + $0xa8] sm:$0xff]  }
  0x2e   :  { %461 = vmatprep.subr.bf16.mxu0 %v624_v0  ;;  %481 = vmatprep.subr.bf16.mxu1 %v624_v0  ;;  %v401_v24 = vld [vmem:[%s731_s2] ss:$0 sm:$0xff]  ;;  %v546_v32 = vld [vmem:[#allocation5 + $0xb0] sm:$0xff]   ;;  %v411_v34 = vld [vmem:[%s731_s2 + $0x1] ss:$0 sm:$0xff]  ;;  %p600_p6 = pnand %p599_p5, %p593_p2 }
  0x2f   :  { %v547_v33 = vld [vmem:[#allocation5 + $0xb8] sm:$0xff]  }
  0x30   :  { %v421_v42 = vld [vmem:[%s731_s2 + $0x2] ss:$0 sm:$0xff] }
  0x31   :  { %462 = vmatpush3.bf16.msra.mxu0 %v526_v3  ;;  %482 = vmatpush3.bf16.msra.mxu1 %v534_v8 }
  0x32   :  { %463 = vmatprep.subr.bf16.mxu0 %v624_v0  ;;  %483 = vmatprep.subr.bf16.mxu1 %v624_v0 }
  0x35   :  { %464 = vmatpush3.bf16.msra.mxu0 %v527_v5  ;;  %484 = vmatpush3.bf16.msra.mxu1 %v535_v10 }
  0x36   :  { %465 = vmatprep.subr.bf16.mxu0 %v624_v0  ;;  %485 = vmatprep.subr.bf16.mxu1 %v624_v0 }
  0x39   :  { %466 = vmatpush3.bf16.msra.mxu0 %v528_v7  ;;  %486 = vmatpush3.bf16.msra.mxu1 %v536_v12 }
  0x3a   :  { %467 = vmatprep.subr.bf16.mxu0 %v624_v0  ;;  %487 = vmatprep.subr.bf16.mxu1 %v624_v0 }
  0x3d   :  { %468 = vmatpush3.bf16.msra.mxu0 %v529_v9  ;;  %488 = vmatpush3.bf16.msra.mxu1 %v537_v14 }
  0x3e   :  { %469 = vmatprep.subr.bf16.mxu0 %v624_v0  ;;  %489 = vmatprep.subr.bf16.mxu1 %v624_v0 }
  0x41   :  { %470 = vmatpush3.bf16.msra.mxu0 %v530_v11  ;;  %490 = vmatpush3.bf16.msra.mxu1 %v538_v16 }
  0x42   :  { %471 = vmatprep.subr.bf16.mxu0 %v624_v0  ;;  %491 = vmatprep.subr.bf16.mxu1 %v624_v0 }
  0x45   :  { %472 = vmatpush3.bf16.msra.mxu0 %v531_v13  ;;  %492 = vmatpush3.bf16.msra.mxu1 %v539_v17 }
  0x46   :  { %497 = vmatprep.subr.bf16.mxu0 %v624_v0 }
  0x48   :  { %474 = vmatmul.mubr.bf16.vlgmr.msra.gmra.mrb[0].mxu0 %v42_v15 }
  0x49   :  { %513 = vmatprep.mubr.msk.bf16.mxu0 %vm625_vm0, %v624_v0  ;;  %498 = vmatpush3.bf16.msra.mxu0 %v540_v18 }
  0x4a   :  { %499 = vmatprep.subr.bf16.mxu0 %v624_v0 }
  0x4d   :  { %500 = vmatpush3.bf16.msra.mxu0 %v541_v19 }
  0x4e   :  { %501 = vmatprep.subr.bf16.mxu0 %v624_v0 }
  0x51   :  { %502 = vmatpush3.bf16.msra.mxu0 %v542_v20 }
  0x52   :  { %503 = vmatprep.subr.bf16.mxu0 %v624_v0 }
  0x55   :  { %504 = vmatpush3.bf16.msra.mxu0 %v543_v21 }
  0x56   :  { %505 = vmatprep.subr.bf16.mxu0 %v624_v0 }
  0x59   :  { %506 = vmatpush3.bf16.msra.mxu0 %v544_v22 }
  0x5a   :  { %507 = vmatprep.subr.bf16.mxu0 %v624_v0 }
  0x5d   :  { %508 = vmatpush3.bf16.msra.mxu0 %v545_v23 }
  0x5e   :  { %509 = vmatprep.subr.bf16.mxu0 %v624_v0 }
  0x61   :  { %510 = vmatpush3.bf16.msra.mxu0 %v546_v32 }
  0x62   :  { %511 = vmatprep.subr.bf16.mxu0 %v624_v0 }
  0x65   :  { %512 = vmatpush3.bf16.msra.mxu0 %v547_v33 }
 0x11b   :  { %v148_v25 = vpop.f32.mrb[0].mxu0 }
 0x11c   :  { %v149_v26 = vadd.f32 %v401_v24, %v148_v25  ;;  %v475_v27 = vpop.f32.mrb[1].mxu0 }
 0x11d   :  { %v151_v28 = vpop.f32.mrb[2].mxu0 }
 0x11e   :  { %v154_v29 = vmax.f32 %v149_v26, 0.0  ;;  %v476_v30 = vpop.f32.mrb[3].mxu0 }
 0x120   :  { %v155_v31 = vpack.c.bf16 %v154_v29, %v154_v29 }
 0x122   :  { %494 = vmatmul.mubr.bf16.vlgmr.msra.gmra.mrb[0].mxu1 %v155_v31 }
 0x1f5   :  { %v263_v35 = vpop.f32.mrb[0].mxu1 }
 0x1f6   :  { %v264_v36 = vadd.f32 %v411_v34, %v263_v35  ;;  %v495_v37 = vpop.f32.mrb[1].mxu1 }
 0x1f7   :  { %v266_v38 = vpop.f32.mrb[2].mxu1 }
 0x1f8   :  { %v269_v39 = vmax.f32 %v264_v36, 0.0  ;;  %v496_v40 = vpop.f32.mrb[3].mxu1 }
 0x1fa   :  { %v270_v41 = vpack.c.bf16 %v269_v39, %v269_v39 }
 0x1fc   :  { %514 = vmatmul.mubr.bf16.vlgmr.msra.gmra.mrb[4].mxu0 %v270_v41 }
 0x2cf   :  { %v378_v43 = vpop.f32.mrb[4].mxu0 }
 0x2d0   :  { %v379_v44 = vadd.f32 %v421_v42, %v378_v43  ;;  %v515_v45 = vpop.f32.mrb[5].mxu0 }
 0x2d1   :  { %v381_v46 = vpop.f32.mrb[6].mxu0 }
 0x2d2   :  { %384 = vst [vmem:[#allocation7] sm:$0xff] %v379_v44  ;;  %v516_v47 = vpop.f32.mrb[7].mxu0 }
 0x2d3   :  { %603 = shalt.err (!%p600_p6)
}
 0x2d4   :  { %s604_s2 = scalar_lea.hbm %s732_s3, 128 }
 0x2d5   :  { %p605_p7 = scmp.ne.s32.totalorder %s732_s3, %s604_s2  ;;  %p608_p8 = scmp.lt.u32.totalorder %s604_s2, %s732_s3 }
 0x2d7   :  { %p610_p9 = pnand %p608_p8, %p605_p7 }
 0x2d9   :  { %613 = shalt.err (!%p610_p9)
}
 0x2da   :  { %394 = dma.vmem_to_hbm [thread:$0]  %s392_s16, 128, %s732_s3, [#allocation4]  }
 0x2db   :  { %618 = dma.done.wait [#allocation4], 128  }
 0x2dc   :  { %619 = vsyncadd [#allocation4], 4294967168 }
 0x2dd   :  { %398 = vsyncpa [#allocation3], 1 }
 0x2de   :  { %399 = vsyncpa [#allocation6], 1 }
 0x2df   :  { %400 = vsyncpa [#allocation4], 1 }

</bundles_post_ra>
